<compile_context>
chip_gen: v6e
topology: v6e:2x2x1
jax: 0.10.0
libtpu: 0.0.40
codegen_flags: <defaults>
</compile_context>

<pallas_src>
import functools

import jax
import jax.numpy as jnp
from jax.experimental import pallas as pl
from jax.experimental.pallas import tpu as pltpu

LANE = 128  # lane-dense padding width for K, Cout and class dims


# ----------------------------------------------------------------------------
# grad_reverse: identity in the forward pass, negated (scaled) gradient in the
# backward pass.  Forward semantics (what we must reproduce) are identity.
# ----------------------------------------------------------------------------
@functools.partial(jax.custom_vjp, nondiff_argnums=(1,))
def grad_reverse(x, lambd=1.0):
    return x


def _grad_reverse_fwd(lambd, x):
    return x, None


def _grad_reverse_bwd(lambd, _, g):
    return (-g * lambd,)


grad_reverse.defvjp(_grad_reverse_fwd, _grad_reverse_bwd)


# ----------------------------------------------------------------------------
# Fused encoder + fc kernel (single program, everything lane-dense).
#   patch_ref  : (N*H*W, KP)   im2col patch matrix, K=9*Cin zero-padded to KP
#   w_ref      : (KP+CP+16, CP) packed weights:
#                  rows [0, KP)          conv weight (im2col rows, Cout cols)
#                  row   KP              conv bias
#                  rows [KP+8, KP+8+CP)  fc weight (Cout rows, class cols)
#                  row   KP+8+CP         fc bias
#   feat_ref   : (N, CP)       pooled features (Cout zero-padded to CP)
#   logits_ref : (N, CP)       logits (classes zero-padded to CP)
# ----------------------------------------------------------------------------
def fused_kernel(patch_ref, w_ref, feat_ref, logits_ref, *, N, HW, KP, CP):
    # Static, sublane-aligned (multiple-of-8 offset) slices of the packed buf.
    wcol = w_ref[0:KP, :]                        # (KP, CP)
    bconv = w_ref[KP:KP + 1, :]                  # (1, CP)
    wfc = w_ref[KP + 8:KP + 8 + CP, :]           # (CP, CP)
    bfc = w_ref[KP + 8 + CP:KP + 9 + CP, :]      # (1, CP)

    # conv3x3 as ONE lane-dense GEMM + bias + ReLU.   (M, KP) @ (KP, CP)
    act = jnp.maximum(
        jnp.dot(patch_ref[...], wcol, preferred_element_type=jnp.float32)
        + bconv,
        0.0,
    )

    # Global average pool as an MXU matmul against a block-diagonal averaging
    # matrix generated in-registers from iota masks (no HBM input, 1/HW folded
    # in).  Row ordering matches the wrapper's n*H*W + h*W + w patch order.
    M = N * HW
    row_ids = jax.lax.broadcasted_iota(jnp.int32, (N, M), 0)
    col_ids = jax.lax.broadcasted_iota(jnp.int32, (N, M), 1)
    in_block = (col_ids >= row_ids * HW) & (col_ids < (row_ids + 1) * HW)
    pool = jnp.where(in_block, jnp.float32(1.0 / HW), jnp.float32(0.0))

    feat = jnp.dot(pool, act, preferred_element_type=jnp.float32)   # (N, CP)
    feat_ref[...] = feat

    # Fused fc: lane-dense logits (class dim padded to CP; sliced outside).
    logits_ref[...] = (
        jnp.dot(feat, wfc, preferred_element_type=jnp.float32) + bfc
    )


def fused_forward(x_nchw, w_packed, cout, num_classes):
    """x_nchw (N, Cin, H, W) -> (feat (N, cout), logits (N, num_classes))."""
    N, Cin, H, W = x_nchw.shape
    HW = H * W
    KP = CP = LANE
    K = 9 * Cin

    # im2col in the wrapper (tiny data, plain XLA): NCHW -> NHWC, 1-pixel halo
    # pad, gather the 9 taps, flatten to a lane-dense (N*H*W, 128) matrix.
    x_nhwc = jnp.transpose(x_nchw, (0, 2, 3, 1)).astype(jnp.float32)
    xpad = jnp.pad(x_nhwc, ((0, 0), (1, 1), (1, 1), (0, 0)))
    taps = [xpad[:, dh:dh + H, dw:dw + W, :]
            for dh in range(3) for dw in range(3)]
    patch = jnp.concatenate(taps, axis=-1).reshape(N * HW, K)
    patch = jnp.pad(patch, ((0, 0), (0, KP - K)))            # (N*HW, 128)

    kernel = functools.partial(fused_kernel, N=N, HW=HW, KP=KP, CP=CP)
    feat_pad, logits_pad = pl.pallas_call(
        kernel,
        out_shape=(
            jax.ShapeDtypeStruct((N, CP), jnp.float32),
            jax.ShapeDtypeStruct((N, CP), jnp.float32),
        ),
        grid=(1,),
        in_specs=[
            pl.BlockSpec((N * HW, KP), lambda i: (0, 0)),
            pl.BlockSpec(w_packed.shape, lambda i: (0, 0)),
        ],
        out_specs=(
            pl.BlockSpec((N, CP), lambda i: (0, 0)),
            pl.BlockSpec((N, CP), lambda i: (0, 0)),
        ),
        compiler_params=pltpu.CompilerParams(
            dimension_semantics=("arbitrary",)
        ),
    )(patch, w_packed)
    return feat_pad[:, :cout], logits_pad[:, :num_classes]


# ----------------------------------------------------------------------------
# Standalone fc kernel — `only_fc` branch (features supplied directly, encoder
# skipped).  Reuses the same packed weight buffer; input/output lane-dense.
# ----------------------------------------------------------------------------
def fc_kernel(x_ref, w_ref, out_ref, *, KP, CP):
    wfc = w_ref[KP + 8:KP + 8 + CP, :]
    bfc = w_ref[KP + 8 + CP:KP + 9 + CP, :]
    out_ref[...] = (
        jnp.dot(x_ref[...], wfc, preferred_element_type=jnp.float32) + bfc
    )


def fc_forward(feat, w_packed, num_classes):
    N, D = feat.shape
    KP = CP = LANE
    x_pad = jnp.pad(feat.astype(jnp.float32), ((0, 0), (0, CP - D)))
    out = pl.pallas_call(
        functools.partial(fc_kernel, KP=KP, CP=CP),
        out_shape=jax.ShapeDtypeStruct((N, CP), jnp.float32),
        grid=(1,),
        in_specs=[
            pl.BlockSpec((N, CP), lambda i: (0, 0)),
            pl.BlockSpec(w_packed.shape, lambda i: (0, 0)),
        ],
        out_specs=pl.BlockSpec((N, CP), lambda i: (0, 0)),
        compiler_params=pltpu.CompilerParams(
            dimension_semantics=("arbitrary",)
        ),
    )(x_pad, w_packed)
    return out[:, :num_classes]


# ----------------------------------------------------------------------------
# MmeResNet wrapper reproducing the PyTorch forward branching.
# ----------------------------------------------------------------------------
class MmeResNetPallas:
    def __init__(self, w_conv, b_conv, w_fc, b_fc):
        kh, kw, cin, cout = w_conv.shape
        num_classes = w_fc.shape[-1]
        KP = CP = LANE
        assert kh * kw * cin <= KP and cout <= CP and num_classes <= CP

        self.num_classes = num_classes
        self.output_dim = cout

        # Pack all weights into ONE lane-dense, 8-row-aligned buffer
        # (built once in __init__, never rebuilt per forward call).
        w_col = jnp.asarray(w_conv, jnp.float32).reshape(kh * kw * cin, cout)
        packed = jnp.zeros((KP + CP + 16, CP), jnp.float32)
        packed = packed.at[:kh * kw * cin, :cout].set(w_col)
        packed = packed.at[KP, :cout].set(
            jnp.asarray(b_conv, jnp.float32).reshape(cout))
        packed = packed.at[KP + 8:KP + 8 + cout, :num_classes].set(
            jnp.asarray(w_fc, jnp.float32))
        packed = packed.at[KP + 8 + CP, :num_classes].set(
            jnp.asarray(b_fc, jnp.float32).reshape(num_classes))
        self.w_packed = packed

    def __call__(self, x, only_fc=False, only_feat=False, reverse=False):
        if only_fc:
            # x is already a flat feature batch here (as in the torch module).
            if reverse:
                x = grad_reverse(x, 1.0)  # identity forward, flips gradient
            return fc_forward(x, self.w_packed, self.num_classes)
        feat, logits = fused_forward(x, self.w_packed, self.output_dim,
                                     self.num_classes)
        if only_feat:
            return feat
        return {"logits": logits, "feat": feat}


if __name__ == "__main__":
    # Small shapes: batch=2, in-channels=4, spatial=16x16, feat dim=32, classes=10.
    N, Cin, H, W = 2, 4, 16, 16
    Cout, NUM_CLASSES = 32, 10

    key = jax.random.PRNGKey(0)
    kx, kw1, kb1, kw2, kb2 = jax.random.split(key, 5)

    x = jax.random.normal(kx, (N, Cin, H, W), dtype=jnp.float32)  # NCHW input
    w_conv = 0.1 * jax.random.normal(kw1, (3, 3, Cin, Cout), dtype=jnp.float32)
    b_conv = 0.1 * jax.random.normal(kb1, (1, Cout), dtype=jnp.float32)
    w_fc = 0.1 * jax.random.normal(kw2, (Cout, NUM_CLASSES), dtype=jnp.float32)
    b_fc = 0.1 * jax.random.normal(kb2, (1, NUM_CLASSES), dtype=jnp.float32)

    model = MmeResNetPallas(w_conv, b_conv, w_fc, b_fc)

    # Default branch: dict with logits + feat (single fused pallas_call).
    out = model(x)
    jax.block_until_ready(out["logits"])
    jax.block_until_ready(out["feat"])
    assert out["logits"].shape == (N, NUM_CLASSES)
    assert out["feat"].shape == (N, Cout)

    # only_feat branch.
    feat = model(x, only_feat=True)
    jax.block_until_ready(feat)

    # only_fc (+reverse) branch: takes pre-computed features.
    logits_rev = model(feat, only_fc=True, reverse=True)
    jax.block_until_ready(logits_rev)

    # Sanity check against a pure-JAX reference of the same synthetic network.
    x_nhwc = jnp.transpose(x, (0, 2, 3, 1))
    ref_conv = jax.lax.conv_general_dilated(
        x_nhwc, w_conv, (1, 1), "SAME",
        dimension_numbers=("NHWC", "HWIO", "NHWC"),
    ) + b_conv[0]
    ref_feat = jnp.mean(jnp.maximum(ref_conv, 0.0), axis=(1, 2))
    ref_logits = ref_feat @ w_fc + b_fc[0]
    assert jnp.allclose(out["feat"], ref_feat, atol=1e-4, rtol=1e-4)
    assert jnp.allclose(out["logits"], ref_logits, atol=1e-4, rtol=1e-4)
    assert jnp.allclose(logits_rev, ref_logits, atol=1e-4, rtol=1e-4)

    print("KERNEL_OK")
</pallas_src>

<mosaic_0001>
module attributes {stable_mosaic.version = 11 : i64} {
  func.func @fused_kernel(%arg0: i32, %arg1: memref<512x128xf32, #tpu.memory_space<vmem>>, %arg2: memref<272x128xf32, #tpu.memory_space<vmem>>, %arg3: memref<2x128xf32, #tpu.memory_space<vmem>>, %arg4: memref<2x128xf32, #tpu.memory_space<vmem>>) attributes {dimension_semantics = [#tpu.dimension_semantics<arbitrary>], iteration_bounds = array<i64: 1>, scalar_prefetch = 0 : i64, scratch_operands = 0 : i64, tpu.core_type = #tpu.core_type<tc>, window_params = [{pipeline_mode = #tpu.pipeline_mode<synchronous>, transform_indices = @transform_0, window_bounds = array<i64: 512, 128>}, {pipeline_mode = #tpu.pipeline_mode<synchronous>, transform_indices = @transform_1, window_bounds = array<i64: 272, 128>}, {pipeline_mode = #tpu.pipeline_mode<synchronous>, transform_indices = @transform_2, window_bounds = array<i64: 2, 128>}, {pipeline_mode = #tpu.pipeline_mode<synchronous>, transform_indices = @transform_3, window_bounds = array<i64: 2, 128>}]} {
    %c0 = arith.constant 0 : index
    %c0_0 = arith.constant 0 : index
    %0 = vector.load %arg2[%c0, %c0_0] : memref<272x128xf32, #tpu.memory_space<vmem>>, vector<128x128xf32>
    %c128 = arith.constant 128 : index
    %c0_1 = arith.constant 0 : index
    %1 = vector.load %arg2[%c128, %c0_1] : memref<272x128xf32, #tpu.memory_space<vmem>>, vector<1x128xf32>
    %c136 = arith.constant 136 : index
    %c0_2 = arith.constant 0 : index
    %2 = vector.load %arg2[%c136, %c0_2] : memref<272x128xf32, #tpu.memory_space<vmem>>, vector<128x128xf32>
    %c264 = arith.constant 264 : index
    %c0_3 = arith.constant 0 : index
    %3 = vector.load %arg2[%c264, %c0_3] : memref<272x128xf32, #tpu.memory_space<vmem>>, vector<1x128xf32>
    %c0_4 = arith.constant 0 : index
    %c0_5 = arith.constant 0 : index
    %4 = vector.load %arg1[%c0_4, %c0_5] : memref<512x128xf32, #tpu.memory_space<vmem>>, vector<512x128xf32>
    %cst = arith.constant dense<0.000000e+00> : vector<512x128xf32>
    %5 = tpu.matmul %4, %0, %cst {dimension_numbers = #tpu.dot_dimension_numbers<[1], [0], [0], [1], [0, 0, 1, 1], [], []>} : vector<512x128xf32>, vector<128x128xf32>, vector<512x128xf32> -> vector<512x128xf32>
    %6 = vector.broadcast %1 : vector<1x128xf32> to vector<512x128xf32>
    %7 = arith.addf %5, %6 : vector<512x128xf32>
    %cst_6 = arith.constant 0.000000e+00 : f32
    %8 = vector.broadcast %cst_6 : f32 to vector<512x128xf32>
    %9 = arith.maximumf %7, %8 : vector<512x128xf32>
    %10 = tpu.iota {dimensions = array<i32: 0>} : vector<2x512xi32>
    %11 = tpu.iota {dimensions = array<i32: 1>} : vector<2x512xi32>
    %c256_i32 = arith.constant 256 : i32
    %12 = vector.broadcast %c256_i32 : i32 to vector<2x512xi32>
    %13 = arith.muli %10, %12 : vector<2x512xi32>
    %14 = arith.cmpi sge, %11, %13 : vector<2x512xi32>
    %c1_i32 = arith.constant 1 : i32
    %15 = vector.broadcast %c1_i32 : i32 to vector<2x512xi32>
    %16 = arith.addi %10, %15 : vector<2x512xi32>
    %c256_i32_7 = arith.constant 256 : i32
    %17 = vector.broadcast %c256_i32_7 : i32 to vector<2x512xi32>
    %18 = arith.muli %16, %17 : vector<2x512xi32>
    %19 = arith.cmpi slt, %11, %18 : vector<2x512xi32>
    %20 = arith.andi %14, %19 : vector<2x512xi1>
    %cst_8 = arith.constant 3.906250e-03 : f32
    %cst_9 = arith.constant 0.000000e+00 : f32
    %21 = vector.broadcast %cst_8 : f32 to vector<2x512xf32>
    %22 = vector.broadcast %cst_9 : f32 to vector<2x512xf32>
    %23 = arith.select %20, %21, %22 : vector<2x512xi1>, vector<2x512xf32>
    %cst_10 = arith.constant dense<0.000000e+00> : vector<2x128xf32>
    %24 = tpu.matmul %23, %9, %cst_10 {dimension_numbers = #tpu.dot_dimension_numbers<[1], [0], [0], [1], [0, 0, 1, 1], [], []>} : vector<2x512xf32>, vector<512x128xf32>, vector<2x128xf32> -> vector<2x128xf32>
    %c0_11 = arith.constant 0 : index
    %c0_12 = arith.constant 0 : index
    %25 = vector.load %arg3[%c0_11, %c0_12] : memref<2x128xf32, #tpu.memory_space<vmem>>, vector<2x128xf32>
    tpu.vector_store %arg3[%c0_11, %c0_12], %24 {strides = array<i32>} : memref<2x128xf32, #tpu.memory_space<vmem>>, vector<2x128xf32>,
    %cst_13 = arith.constant dense<0.000000e+00> : vector<2x128xf32>
    %26 = tpu.matmul %24, %2, %cst_13 {dimension_numbers = #tpu.dot_dimension_numbers<[1], [0], [0], [1], [0, 0, 1, 1], [], []>} : vector<2x128xf32>, vector<128x128xf32>, vector<2x128xf32> -> vector<2x128xf32>
    %27 = vector.broadcast %3 : vector<1x128xf32> to vector<2x128xf32>
    %28 = arith.addf %26, %27 : vector<2x128xf32>
    %c0_14 = arith.constant 0 : index
    %c0_15 = arith.constant 0 : index
    %29 = vector.load %arg4[%c0_14, %c0_15] : memref<2x128xf32, #tpu.memory_space<vmem>>, vector<2x128xf32>
    tpu.vector_store %arg4[%c0_14, %c0_15], %28 {strides = array<i32>} : memref<2x128xf32, #tpu.memory_space<vmem>>, vector<2x128xf32>,
    return
  }
  func.func @transform_0(%arg0: i32) -> (i32, i32) {
    %c0_i32 = arith.constant 0 : i32
    %c0_i32_0 = arith.constant 0 : i32
    %c0_i32_1 = arith.constant 0 : i32
    return %c0_i32, %c0_i32_0 : i32, i32
  }
  func.func @transform_1(%arg0: i32) -> (i32, i32) {
    %c0_i32 = arith.constant 0 : i32
    %c0_i32_0 = arith.constant 0 : i32
    %c0_i32_1 = arith.constant 0 : i32
    return %c0_i32, %c0_i32_0 : i32, i32
  }
  func.func @transform_2(%arg0: i32) -> (i32, i32) {
    %c0_i32 = arith.constant 0 : i32
    %c0_i32_0 = arith.constant 0 : i32
    %c0_i32_1 = arith.constant 0 : i32
    return %c0_i32, %c0_i32_0 : i32, i32
  }
  func.func @transform_3(%arg0: i32) -> (i32, i32) {
    %c0_i32 = arith.constant 0 : i32
    %c0_i32_0 = arith.constant 0 : i32
    %c0_i32_1 = arith.constant 0 : i32
    return %c0_i32, %c0_i32_0 : i32, i32
  }
}

</mosaic_0001>

<bundles_post_ra>
// kernel: tpu_custom_call.1
= control target key start
LH: loop header
LB: loop body
LE: loop exit
PB: predicated region body
PF: predicated region fallthrough
CT: control target
= control target key end

     0   :  { %9 = vsyncpa [#allocation3], 0  ;;  %s1527_s0 = inlined_call_operand.hbm [shape: f32[512,128], index: 0, kind: input, shape index: {}]   ;;  %s1528_s1 = inlined_call_operand.hbm [shape: f32[272,128], index: 1, kind: input, shape index: {}]   ;;  %s1529_s2 = inlined_call_operand.hbm [shape: f32[2,128], index: 2, kind: output, shape index: {0}]   ;;  %s1530_s3 = inlined_call_operand.hbm [shape: f32[2,128], index: 3, kind: output, shape index: {1}]  }
   0x1   :  { %10 = vsyncpa [#allocation6], 0 }
   0x2   :  { %11 = vsyncpa [#allocation4], 0 }
   0x3   :  { %12 = vsyncpa [#allocation9], 0  ;;  %s1299_s12 = smov [#allocation2]  }
   0x4   :  { %s18_s13 = sshll.u32 %s1299_s12, 4  ;;  %s19_s13 = int_to_ptr.vmem [resolvable:$true] %s18_s13 }
   0x5   :  { %s1219_s14 = scalar_lea.vmem %s19_s13, 8192  ;;  %p1224_p1 = scmp.lt.s32.totalorder %s19_s13, %s19_s13 }
   0x6   :  { %p1220_p0 = scmp.ne.s32.totalorder %s19_s13, %s1219_s14  ;;  %p1225_p2 = scmp.lt.s32.totalorder %s1219_s14, %s1219_s14 }
   0x8   :  { %p1226_p3 = por %p1225_p2, %p1224_p1 }
   0xa   :  { %p1227_p4 = pnand %p1226_p3, %p1220_p0 }
   0xc   :  { %1230 = shalt.err (!%p1227_p4)
}
   0xd   :  { %s1300_s15 = smov 128   ;;  %s1301_s16 = smov 8  }
   0xe   :  { %24 = dma.hbm_to_vmem [thread:$0]  %s1527_s0, 8192, %s19_s13, [#allocation3], %s1300_s15, %s1300_s15, %s1301_s16  }
   0xf   :  { %s1302_s19 = smov [#allocation5]  }
  0x10   :  { %s30_s20 = sshll.u32 %s1302_s19, 4  ;;  %s31_s20 = int_to_ptr.vmem [resolvable:$true] %s30_s20 }
  0x11   :  { %s1239_s21 = scalar_lea.vmem %s31_s20, 4352  ;;  %p1244_p6 = scmp.lt.s32.totalorder %s31_s20, %s31_s20 }
  0x12   :  { %p1240_p5 = scmp.ne.s32.totalorder %s31_s20, %s1239_s21  ;;  %p1245_p7 = scmp.lt.s32.totalorder %s1239_s21, %s1239_s21 }
  0x14   :  { %p1246_p8 = por %p1245_p7, %p1244_p6 }
  0x16   :  { %p1247_p9 = pnand %p1246_p8, %p1240_p5 }
  0x18   :  { %1250 = shalt.err (!%p1247_p9)
}
  0x19   :  { %36 = dma.hbm_to_vmem [thread:$0]  %s1528_s1, 4352, %s31_s20, [#allocation6], %s1300_s15, %s1300_s15, %s1301_s16  }
  0x1a   :  { %1291 = dma.done.wait [#allocation3], 8192  }
  0x1b   :  { %1292 = vsyncadd [#allocation3], 4294959104 }
  0x1c   :  { %1293 = dma.done.wait [#allocation6], 4352  }
  0x1d   :  { %1294 = vsyncadd [#allocation6], 4294962944  ;;  %v58_v0 = vld [vmem:[#allocation5 + $0x78] sm:$0xff]  ;;  %v57_v1 = vld [vmem:[#allocation5 + $0x70] sm:$0xff]  ;;  %vm1305_vm12 = vmmov 0   ;;  %s1306_s0 = smov [#allocation7]  }
  0x1e   :  { %1039 = vmatprep.subr.mxu0 %v58_v0  ;;  %v56_v2 = vld [vmem:[#allocation5 + $0x68] sm:$0xff]  ;;  %v55_v3 = vld [vmem:[#allocation5 + $0x60] sm:$0xff]  ;;  %v54_v5 = vld [vmem:[#allocation5 + $0x58] sm:$0xff]  ;;  %s842_s1 = sshll.u32 %s1306_s0, 4  ;;  %s843_s1 = int_to_ptr.vmem [resolvable:$true] %s842_s1 }
  0x1f   :  { %1040 = vmatpush3.msra.mxu0 %v58_v0  ;;  %v77_v4 = vld [vmem:[#allocation2] sm:$0xff]  ;;  %v53_v6 = vld [vmem:[#allocation5 + $0x50] sm:$0xff]  ;;  %v52_v7 = vld [vmem:[#allocation5 + $0x48] sm:$0xff]  ;;  %s1251_s24 = scalar_lea.vmem %s843_s1, 32  ;;  %p1256_p11 = scmp.lt.s32.totalorder %s843_s1, %s843_s1 }
  0x20   :  { %1041 = vmatprep.subr.mxu0 %v57_v1  ;;  %1071 = vmatprep.mubr.f32.mxu0 %v77_v4  ;;  %v51_v8 = vld [vmem:[#allocation5 + $0x40] sm:$0xff]  ;;  %v50_v9 = vld [vmem:[#allocation5 + $0x38] sm:$0xff]  ;;  %v49_v10 = vld [vmem:[#allocation5 + $0x30] sm:$0xff]  ;;  %p1252_p10 = scmp.ne.s32.totalorder %s843_s1, %s1251_s24  ;;  %p1257_p12 = scmp.lt.s32.totalorder %s1251_s24, %s1251_s24 }
  0x21   :  { %1042 = vmatpush3.msra.mxu0 %v57_v1  ;;  %v48_v11 = vld [vmem:[#allocation5 + $0x28] sm:$0xff]  ;;  %v47_v12 = vld [vmem:[#allocation5 + $0x20] sm:$0xff]  ;;  %v46_v13 = vld [vmem:[#allocation5 + $0x18] sm:$0xff] }
  0x22   :  { %1043 = vmatprep.subr.mxu0 %v56_v2  ;;  %v45_v14 = vld [vmem:[#allocation5 + $0x10] sm:$0xff]  ;;  %v44_v15 = vld [vmem:[#allocation5 + $0x8] sm:$0xff]  ;;  %v43_v16 = vld [vmem:[#allocation5] sm:$0xff]  ;;  %p1258_p13 = por %p1257_p12, %p1256_p11 }
  0x23   :  { %1044 = vmatpush3.msra.mxu0 %v56_v2  ;;  %v78_v17 = vld [vmem:[#allocation2 + $0x8] sm:$0xff]  ;;  %v79_v18 = vld [vmem:[#allocation2 + $0x10] sm:$0xff]  ;;  %v80_v19 = vld [vmem:[#allocation2 + $0x18] sm:$0xff] }
  0x24   :  { %1045 = vmatprep.subr.mxu0 %v55_v3  ;;  %v81_v20 = vld [vmem:[#allocation2 + $0x20] sm:$0xff]  ;;  %v82_v21 = vld [vmem:[#allocation2 + $0x28] sm:$0xff]  ;;  %v83_v22 = vld [vmem:[#allocation2 + $0x30] sm:$0xff]  ;;  %p1259_p0 = pnand %p1258_p13, %p1252_p10 }
  0x25   :  { %1046 = vmatpush3.msra.mxu0 %v55_v3  ;;  %v84_v23 = vld [vmem:[#allocation2 + $0x38] sm:$0xff]  ;;  %v85_v24 = vld [vmem:[#allocation2 + $0x40] sm:$0xff]  ;;  %v86_v25 = vld [vmem:[#allocation2 + $0x48] sm:$0xff] }
  0x26   :  { %1047 = vmatprep.subr.mxu0 %v54_v5  ;;  %v87_v26 = vld [vmem:[#allocation2 + $0x50] sm:$0xff]  ;;  %v88_v27 = vld [vmem:[#allocation2 + $0x58] sm:$0xff]  ;;  %v89_v28 = vld [vmem:[#allocation2 + $0x60] sm:$0xff] }
  0x27   :  { %1048 = vmatpush3.msra.mxu0 %v54_v5  ;;  %v90_v29 = vld [vmem:[#allocation2 + $0x68] sm:$0xff]  ;;  %v91_v30 = vld [vmem:[#allocation2 + $0x70] sm:$0xff]  ;;  %v92_v31 = vld [vmem:[#allocation2 + $0x78] sm:$0xff] }
  0x28   :  { %1049 = vmatprep.subr.mxu0 %v53_v6  ;;  %v93_v32 = vld [vmem:[#allocation2 + $0x80] sm:$0xff]  ;;  %v94_v33 = vld [vmem:[#allocation2 + $0x88] sm:$0xff]  ;;  %v95_v34 = vld [vmem:[#allocation2 + $0x90] sm:$0xff] }
  0x29   :  { %1050 = vmatpush3.msra.mxu0 %v53_v6  ;;  %v96_v35 = vld [vmem:[#allocation2 + $0x98] sm:$0xff]  ;;  %v97_v36 = vld [vmem:[#allocation2 + $0xa0] sm:$0xff]  ;;  %v98_v37 = vld [vmem:[#allocation2 + $0xa8] sm:$0xff] }
  0x2a   :  { %1051 = vmatprep.subr.mxu0 %v52_v7  ;;  %v99_v38 = vld [vmem:[#allocation2 + $0xb0] sm:$0xff]  ;;  %v100_v39 = vld [vmem:[#allocation2 + $0xb8] sm:$0xff]  ;;  %v101_v40 = vld [vmem:[#allocation2 + $0xc0] sm:$0xff] }
  0x2b   :  { %1052 = vmatpush3.msra.mxu0 %v52_v7  ;;  %v102_v41 = vld [vmem:[#allocation2 + $0xc8] sm:$0xff]  ;;  %v103_v42 = vld [vmem:[#allocation2 + $0xd0] sm:$0xff]  ;;  %v104_v43 = vld [vmem:[#allocation2 + $0xd8] sm:$0xff] }
  0x2c   :  { %1053 = vmatprep.subr.mxu0 %v51_v8  ;;  %v105_v44 = vld [vmem:[#allocation2 + $0xe0] sm:$0xff]  ;;  %v106_v45 = vld [vmem:[#allocation2 + $0xe8] sm:$0xff]  ;;  %v107_v46 = vld [vmem:[#allocation2 + $0xf0] sm:$0xff] }
  0x2d   :  { %1054 = vmatpush3.msra.mxu0 %v51_v8  ;;  %v108_v47 = vld [vmem:[#allocation2 + $0xf8] sm:$0xff]  ;;  %v109_v48 = vld [vmem:[#allocation2 + $0x100] sm:$0xff]  ;;  %v110_v49 = vld [vmem:[#allocation2 + $0x108] sm:$0xff] }
  0x2e   :  { %1055 = vmatprep.subr.mxu0 %v50_v9  ;;  %v111_v50 = vld [vmem:[#allocation2 + $0x110] sm:$0xff]  ;;  %v112_v51 = vld [vmem:[#allocation2 + $0x118] sm:$0xff]  ;;  %v113_v52 = vld [vmem:[#allocation2 + $0x120] sm:$0xff] }
  0x2f   :  { %1056 = vmatpush3.msra.mxu0 %v50_v9  ;;  %v114_v53 = vld [vmem:[#allocation2 + $0x128] sm:$0xff]  ;;  %v115_v54 = vld [vmem:[#allocation2 + $0x130] sm:$0xff]  ;;  %v116_v55 = vld [vmem:[#allocation2 + $0x138] sm:$0xff] }
  0x30   :  { %1057 = vmatprep.subr.mxu0 %v49_v10  ;;  %v117_v56 = vld [vmem:[#allocation2 + $0x140] sm:$0xff]  ;;  %v118_v57 = vld [vmem:[#allocation2 + $0x148] sm:$0xff]  ;;  %v119_v58 = vld [vmem:[#allocation2 + $0x150] sm:$0xff] }
  0x31   :  { %1058 = vmatpush3.msra.mxu0 %v49_v10  ;;  %v120_v59 = vld [vmem:[#allocation2 + $0x158] sm:$0xff]  ;;  %v121_v60 = vld [vmem:[#allocation2 + $0x160] sm:$0xff]  ;;  %v122_v61 = vld [vmem:[#allocation2 + $0x168] sm:$0xff] }
  0x32   :  { %1059 = vmatprep.subr.mxu0 %v48_v11  ;;  %v123_v62 = vld [vmem:[#allocation2 + $0x170] sm:$0xff]  ;;  %v124_v63 = vld [vmem:[#allocation2 + $0x178] sm:$0xff]  ;;  %v125_v0 = vld [vmem:[#allocation2 + $0x180] sm:$0xff] }
  0x33   :  { %1060 = vmatpush3.msra.mxu0 %v48_v11  ;;  %v126_v1 = vld [vmem:[#allocation2 + $0x188] sm:$0xff]  ;;  %v127_v2 = vld [vmem:[#allocation2 + $0x190] sm:$0xff]  ;;  %v128_v3 = vld [vmem:[#allocation2 + $0x198] sm:$0xff] }
  0x34   :  { %1061 = vmatprep.subr.mxu0 %v47_v12  ;;  %v129_v4 = vld [vmem:[#allocation2 + $0x1a0] sm:$0xff]  ;;  %v130_v5 = vld [vmem:[#allocation2 + $0x1a8] sm:$0xff]  ;;  %v131_v6 = vld [vmem:[#allocation2 + $0x1b0] sm:$0xff] }
  0x35   :  { %1062 = vmatpush3.msra.mxu0 %v47_v12  ;;  %v132_v7 = vld [vmem:[#allocation2 + $0x1b8] sm:$0xff]  ;;  %v133_v8 = vld [vmem:[#allocation2 + $0x1c0] sm:$0xff]  ;;  %v134_v9 = vld [vmem:[#allocation2 + $0x1c8] sm:$0xff] }
  0x36   :  { %1063 = vmatprep.subr.mxu0 %v46_v13  ;;  %v135_v10 = vld [vmem:[#allocation2 + $0x1d0] sm:$0xff]  ;;  %v136_v11 = vld [vmem:[#allocation2 + $0x1d8] sm:$0xff]  ;;  %v137_v12 = vld [vmem:[#allocation2 + $0x1e0] sm:$0xff] }
  0x37   :  { %1064 = vmatpush3.msra.mxu0 %v46_v13  ;;  %v138_v13 = vld [vmem:[#allocation2 + $0x1e8] sm:$0xff] }
  0x38   :  { %1065 = vmatprep.subr.mxu0 %v45_v14 }
  0x39   :  { %1066 = vmatpush3.msra.mxu0 %v45_v14  ;;  %v139_v14 = vld [vmem:[#allocation2 + $0x1f0] sm:$0xff] }
  0x3a   :  { %1067 = vmatprep.subr.mxu0 %v44_v15 }
  0x3b   :  { %1068 = vmatpush3.msra.mxu0 %v44_v15  ;;  %v140_v15 = vld [vmem:[#allocation2 + $0x1f8] sm:$0xff] }
  0x3c   :  { %1069 = vmatprep.subr.mxu0 %v43_v16 }
  0x3d   :  { %1070 = vmatpush3.msra.mxu0 %v43_v16  ;;  %v594_v16 = vlaneseq }
  0x3e   :  { %1072 = vmatmul.mubr.f32.vlgmr.msra.gmra.mxu0 %v78_v17 }
  0x3f   :  { %1074 = vmatprep.mubr.f32.mxu0 %v79_v18  ;;  %v595_v17 = vshrl.u32 %v594_v16, 7  ;;  %v597_v18 = vand.u32 127, %v594_v16 }
  0x42   :  { %1075 = vmatmul.mubr.f32.gmra.mxu0 %v80_v19  ;;  %v606_v19 = vadd.s32 1, %v595_v17 }
  0x43   :  { %1077 = vmatprep.mubr.f32.mxu0 %v81_v20  ;;  %v598_v20 = vadd.s32 128, %v597_v18 }
  0x46   :  { %1078 = vmatmul.mubr.f32.gmra.mxu0 %v82_v21  ;;  %v601_v21 = vmul.u32 256, %v595_v17 }
  0x47   :  { %1080 = vmatprep.mubr.f32.mxu0 %v83_v22  ;;  %v607_v22 = vmul.u32 256, %v606_v19 }
  0x48   :  { %vm603_vm0 = vcmp.ge.s32.totalorder %v598_v20, %v601_v21  ;;  %vm602_vm3 = vcmp.ge.s32.totalorder %v597_v18, %v601_v21 }
  0x49   :  { %vm609_vm1 = vcmp.lt.s32.totalorder %v598_v20, %v607_v22  ;;  %vm608_vm4 = vcmp.lt.s32.totalorder %v597_v18, %v607_v22 }
  0x4a   :  { %1081 = vmatmul.mubr.f32.gmra.mxu0 %v84_v23  ;;  %vm613_vm2 = vmand %vm603_vm0, %vm609_vm1  ;;  %v1303_v23 = vmov 0.00390625  }
  0x4b   :  { %1083 = vmatprep.mubr.f32.mxu0 %v85_v24  ;;  %867 = vmatprep.mubr.msk.f32.mxu1 %vm613_vm2, %v1303_v23  ;;  %vm1335_vm5 = vmand %vm602_vm3, %vm608_vm4 }
  0x4e   :  { %1084 = vmatmul.mubr.f32.gmra.mxu0 %v86_v25 }
  0x4f   :  { %1086 = vmatprep.mubr.f32.mxu0 %v87_v26 }
  0x52   :  { %1087 = vmatmul.mubr.f32.gmra.mxu0 %v88_v27 }
  0x53   :  { %1089 = vmatprep.mubr.f32.mxu0 %v89_v28 }
  0x56   :  { %1090 = vmatmul.mubr.f32.gmra.mxu0 %v90_v29 }
  0x57   :  { %1092 = vmatprep.mubr.f32.mxu0 %v91_v30 }
  0x5a   :  { %1093 = vmatmul.mubr.f32.gmra.mxu0 %v92_v31 }
  0x5b   :  { %1095 = vmatprep.mubr.f32.mxu0 %v93_v32 }
  0x5e   :  { %1096 = vmatmul.mubr.f32.gmra.mxu0 %v94_v33 }
  0x5f   :  { %1098 = vmatprep.mubr.f32.mxu0 %v95_v34 }
  0x62   :  { %1099 = vmatmul.mubr.f32.gmra.mxu0 %v96_v35 }
  0x63   :  { %1101 = vmatprep.mubr.f32.mxu0 %v97_v36 }
  0x66   :  { %1102 = vmatmul.mubr.f32.gmra.mxu0 %v98_v37 }
  0x67   :  { %1104 = vmatprep.mubr.f32.mxu0 %v99_v38 }
  0x6a   :  { %1105 = vmatmul.mubr.f32.gmra.mxu0 %v100_v39 }
  0x6b   :  { %1107 = vmatprep.mubr.f32.mxu0 %v101_v40  ;;  %v600_v40 = vadd.s32 384, %v597_v18 }
  0x6d   :  { %vm605_vm6 = vcmp.ge.s32.totalorder %v600_v40, %v601_v21  ;;  %vm611_vm7 = vcmp.lt.s32.totalorder %v600_v40, %v607_v22 }
  0x6e   :  { %1108 = vmatmul.mubr.f32.gmra.mxu0 %v102_v41  ;;  %v599_v41 = vadd.s32 256, %v597_v18  ;;  %vm1359_vm8 = vmand %vm605_vm6, %vm611_vm7 }
  0x6f   :  { %1110 = vmatprep.mubr.f32.mxu0 %v103_v42 }
  0x70   :  { %vm604_vm9 = vcmp.ge.s32.totalorder %v599_v41, %v601_v21  ;;  %vm610_vm10 = vcmp.lt.s32.totalorder %v599_v41, %v607_v22 }
  0x71   :  { %vm1365_vm11 = vmand %vm604_vm9, %vm610_vm10 }
  0x72   :  { %1111 = vmatmul.mubr.f32.gmra.mxu0 %v104_v43 }
  0x73   :  { %1113 = vmatprep.mubr.f32.mxu0 %v105_v44 }
  0x76   :  { %1114 = vmatmul.mubr.f32.gmra.mxu0 %v106_v45  ;;  %v69_v45 = vld [vmem:[#allocation5 + $0xd0] sm:$0xff] }
  0x77   :  { %1116 = vmatprep.mubr.f32.mxu0 %v107_v46 }
  0x7a   :  { %1117 = vmatmul.mubr.f32.gmra.mxu0 %v108_v47 }
  0x7b   :  { %1119 = vmatprep.mubr.f32.mxu0 %v109_v48 }
  0x7e   :  { %1120 = vmatmul.mubr.f32.gmra.mxu0 %v110_v49 }
  0x7f   :  { %1122 = vmatprep.mubr.f32.mxu0 %v111_v50 }
  0x82   :  { %1123 = vmatmul.mubr.f32.gmra.mxu0 %v112_v51 }
  0x83   :  { %1125 = vmatprep.mubr.f32.mxu0 %v113_v52 }
  0x86   :  { %1126 = vmatmul.mubr.f32.gmra.mxu0 %v114_v53 }
  0x87   :  { %1128 = vmatprep.mubr.f32.mxu0 %v115_v54 }
  0x8a   :  { %1129 = vmatmul.mubr.f32.gmra.mxu0 %v116_v55 }
  0x8b   :  { %1131 = vmatprep.mubr.f32.mxu0 %v117_v56 }
  0x8e   :  { %1132 = vmatmul.mubr.f32.gmra.mxu0 %v118_v57 }
  0x8f   :  { %1134 = vmatprep.mubr.f32.mxu0 %v119_v58 }
  0x92   :  { %1135 = vmatmul.mubr.f32.gmra.mxu0 %v120_v59  ;;  %v1379_v59 = vld [vmem:[#allocation5 + $0x80] ss:$0 sm:$0xff] }
  0x93   :  { %1137 = vmatprep.mubr.f32.mxu0 %v121_v60 }
  0x96   :  { %1138 = vmatmul.mubr.f32.gmra.mxu0 %v122_v61 }
  0x97   :  { %1140 = vmatprep.mubr.f32.mxu0 %v123_v62 }
  0x9a   :  { %1141 = vmatmul.mubr.f32.gmra.mxu0 %v124_v63 }
  0x9b   :  { %1143 = vmatprep.mubr.f32.mxu0 %v125_v0 }
  0x9e   :  { %1144 = vmatmul.mubr.f32.gmra.mxu0 %v126_v1 }
  0x9f   :  { %1146 = vmatprep.mubr.f32.mxu0 %v127_v2 }
  0xa2   :  { %1147 = vmatmul.mubr.f32.gmra.mxu0 %v128_v3 }
  0xa3   :  { %1149 = vmatprep.mubr.f32.mxu0 %v129_v4 }
  0xa6   :  { %1150 = vmatmul.mubr.f32.gmra.mxu0 %v130_v5 }
  0xa7   :  { %1152 = vmatprep.mubr.f32.mxu0 %v131_v6 }
  0xaa   :  { %1153 = vmatmul.mubr.f32.gmra.mxu0 %v132_v7 }
  0xab   :  { %1155 = vmatprep.mubr.f32.mxu0 %v133_v8 }
  0xae   :  { %1156 = vmatmul.mubr.f32.gmra.mxu0 %v134_v9 }
  0xaf   :  { %1158 = vmatprep.mubr.f32.mxu0 %v135_v10 }
  0xb2   :  { %1159 = vmatmul.mubr.f32.gmra.mxu0 %v136_v11 }
  0xb3   :  { %1161 = vmatprep.mubr.f32.mxu0 %v137_v12 }
  0xb6   :  { %1162 = vmatmul.mubr.f32.gmra.mxu0 %v138_v13 }
  0xb7   :  { %1164 = vmatprep.mubr.f32.mxu0 %v139_v14 }
  0xba   :  { %1165 = vmatmul.mubr.f32.gmra.mxu0 %v140_v15 }
  0xfe   :  { %v1339_v25 = vpop.f32.mrf.mxu0 }
 0x100   :  { %v1341_v26 = vpop.f32.mrf.mxu0 }
 0x102   :  { %v1343_v27 = vpop.f32.mrf.mxu0 }
 0x104   :  { %v1345_v28 = vpop.f32.mrf.mxu0 }
 0x106   :  { %v1347_v29 = vpop.f32.mrf.mxu0 }
 0x108   :  { %v1349_v30 = vpop.f32.mrf.mxu0 }
 0x10a   :  { %v1351_v31 = vpop.f32.mrf.mxu0 }
 0x10c   :  { %v1353_v32 = vpop.f32.mrf.mxu0 }
 0x10e   :  { %v1355_v33 = vpop.f32.mrf.mxu0 }
 0x110   :  { %v1357_v34 = vpop.f32.mrf.mxu0 }
 0x112   :  { %v1088_v35 = vpop.f32.mrf.mxu0 }
 0x113   :  { %v267_v14 = vadd.f32 %v1088_v35, %v1379_v59  ;;  %v257_v35 = vadd.f32 %v1355_v33, %v1379_v59  ;;  %v247_v33 = vadd.f32 %v1351_v31, %v1379_v59  ;;  %v237_v31 = vadd.f32 %v1347_v29, %v1379_v59 }
 0x114   :  { %v261_v36 = vpop.f32.mrf.mxu0 }
 0x115   :  { %v262_v19 = vadd.f32 %v1379_v59, %v261_v36  ;;  %v252_v36 = vadd.f32 %v1379_v59, %v1357_v34  ;;  %v242_v34 = vadd.f32 %v1379_v59, %v1353_v32 }
 0x116   :  { %v1091_v37 = vpop.f32.mrf.mxu0 }
 0x117   :  { %v277_v4 = vadd.f32 %v1091_v37, %v1379_v59 }
 0x118   :  { %v271_v38 = vpop.f32.mrf.mxu0 }
 0x119   :  { %v272_v9 = vadd.f32 %v1379_v59, %v271_v38  ;;  %v543_v15 = vmax.f32 %v277_v4, 0.0  ;;  %v541_v38 = vmax.f32 %v267_v14, 0.0 }
 0x11a   :  { %v1094_v39 = vpop.f32.mrf.mxu0 }
 0x11b   :  { %v287_v60 = vadd.f32 %v1094_v39, %v1379_v59  ;;  %v542_v20 = vmax.f32 %v272_v9, 0.0  ;;  %v222_v9 = vadd.f32 %v1379_v59, %v1345_v28  ;;  %v212_v28 = vadd.f32 %v1379_v59, %v1341_v26 }
 0x11c   :  { %v281_v42 = vpop.f32.mrf.mxu0 }
 0x11d   :  { %v282_v63 = vadd.f32 %v1379_v59, %v281_v42  ;;  %v545_v5 = vmax.f32 %v287_v60, 0.0  ;;  %v540_v42 = vmax.f32 %v262_v19, 0.0 }
 0x11e   :  { %v1363_v44 = vpop.f32.mrf.mxu0 }
 0x11f   :  { %v544_v10 = vmax.f32 %v282_v63, 0.0 }
 0x120   :  { %v1369_v46 = vpop.f32.mrf.mxu0 }
 0x122   :  { %v1371_v47 = vpop.f32.mrf.mxu0 }
 0x124   :  { %v1373_v48 = vpop.f32.mrf.mxu0 }
 0x126   :  { %v1375_v49 = vpop.f32.mrf.mxu0 }
 0x128   :  { %v1377_v50 = vpop.f32.mrf.mxu0 }
 0x12a   :  { %v1106_v51 = vpop.f32.mrf.mxu0 }
 0x12c   :  { %v321_v52 = vpop.f32.mrf.mxu0 }
 0x12e   :  { %v1109_v53 = vpop.f32.mrf.mxu0 }
 0x12f   :  { %v337_v22 = vadd.f32 %v1109_v53, %v1379_v59  ;;  %v327_v53 = vadd.f32 %v1106_v51, %v1379_v59  ;;  %v317_v51 = vadd.f32 %v1375_v49, %v1379_v59  ;;  %v307_v49 = vadd.f32 %v1371_v47, %v1379_v59 }
 0x130   :  { %v331_v54 = vpop.f32.mrf.mxu0  ;;  %v297_v47 = vadd.f32 %v1363_v44, %v1379_v59 }
 0x131   :  { %v332_v40 = vadd.f32 %v1379_v59, %v331_v54  ;;  %v322_v54 = vadd.f32 %v1379_v59, %v321_v52  ;;  %v553_v63 = vmax.f32 %v327_v53, 0.0  ;;  %v312_v52 = vadd.f32 %v1379_v59, %v1377_v50 }
 0x132   :  { %v1112_v55 = vpop.f32.mrf.mxu0  ;;  %v551_v29 = vmax.f32 %v317_v51, 0.0  ;;  %v302_v50 = vadd.f32 %v1379_v59, %v1373_v48  ;;  %v292_v48 = vadd.f32 %v1379_v59, %v1369_v46  ;;  %v547_v44 = vmax.f32 %v297_v47, 0.0 }
 0x133   :  { %v347_v12 = vadd.f32 %v1112_v55, %v1379_v59  ;;  %v554_v60 = vmax.f32 %v332_v40, 0.0  ;;  %v552_v32 = vmax.f32 %v322_v54, 0.0 }
 0x134   :  { %v341_v56 = vpop.f32.mrf.mxu0 }
 0x135   :  { %v342_v17 = vadd.f32 %v1379_v59, %v341_v56  ;;  %v557_v37 = vmax.f32 %v347_v12, 0.0  ;;  %v555_v56 = vmax.f32 %v337_v22, 0.0 }
 0x136   :  { %v1115_v57 = vpop.f32.mrf.mxu0 }
 0x137   :  { %v357_v1 = vadd.f32 %v1115_v57, %v1379_v59  ;;  %v556_v41 = vmax.f32 %v342_v17, 0.0  ;;  %v539_v57 = vmax.f32 %v257_v35, 0.0  ;;  %v548_v17 = vmax.f32 %v302_v50, 0.0 }
 0x138   :  { %v351_v58 = vpop.f32.mrf.mxu0 }
 0x139   :  { %v352_v7 = vadd.f32 %v1379_v59, %v351_v58  ;;  %v559_v13 = vmax.f32 %v357_v1, 0.0 }
 0x13a   :  { %v1118_v61 = vpop.f32.mrf.mxu0 }
 0x13b   :  { %v367_v62 = vadd.f32 %v1118_v61, %v1379_v59  ;;  %v558_v18 = vmax.f32 %v352_v7, 0.0  ;;  %v538_v61 = vmax.f32 %v252_v36, 0.0  ;;  %v535_v7 = vmax.f32 %v237_v31, 0.0 }
 0x13c   :  { %v361_v0 = vpop.f32.mrf.mxu0 }
 0x13d   :  { %v362_v2 = vadd.f32 %v1379_v59, %v361_v0  ;;  %v561_v3 = vmax.f32 %v367_v62, 0.0  ;;  %v537_v0 = vmax.f32 %v247_v33, 0.0 }
 0x13e   :  { %v1387_v6 = vpop.f32.mrf.mxu0 }
 0x13f   :  { %v560_v8 = vmax.f32 %v362_v2, 0.0  ;;  %952 = vmatprep.subr.mxu1 %v561_v3  ;;  %v232_v2 = vadd.f32 %v1379_v59, %v1349_v30  ;;  %v536_v3 = vmax.f32 %v242_v34, 0.0  ;;  %v550_v30 = vmax.f32 %v312_v52, 0.0 }
 0x140   :  { %v1391_v11 = vpop.f32.mrf.mxu0  ;;  %953 = vmatpush3.msra.mxu1 %v545_v5  ;;  %v227_v5 = vadd.f32 %v1343_v27, %v1379_v59  ;;  %v549_v27 = vmax.f32 %v307_v49, 0.0 }
 0x141   :  { %954 = vmatprep.subr.mxu1 %v560_v8 }
 0x142   :  { %v1395_v16 = vpop.f32.mrf.mxu0  ;;  %955 = vmatpush3.msra.mxu1 %v544_v10  ;;  %v534_v10 = vmax.f32 %v232_v2, 0.0  ;;  %v533_v14 = vmax.f32 %v227_v5, 0.0 }
 0x143   :  { %956 = vmatprep.subr.mxu1 %v559_v13  ;;  %v217_v13 = vadd.f32 %v1339_v25, %v1379_v59  ;;  %v546_v25 = vmax.f32 %v292_v48, 0.0 }
 0x144   :  { %v1399_v21 = vpop.f32.mrf.mxu0  ;;  %957 = vmatpush3.msra.mxu1 %v543_v15 }
 0x145   :  { %958 = vmatprep.subr.mxu1 %v558_v18  ;;  %v532_v18 = vmax.f32 %v222_v9, 0.0 }
 0x146   :  { %v1404_v39 = vpop.f32.mrf.mxu0  ;;  %959 = vmatpush3.msra.mxu1 %v542_v20  ;;  %v531_v20 = vmax.f32 %v217_v13, 0.0 }
 0x147   :  { %960 = vmatprep.subr.mxu1 %v557_v37  ;;  %v530_v37 = vmax.f32 %v212_v28, 0.0 }
 0x148   :  { %v1409_v55 = vpop.f32.mrf.mxu0  ;;  %961 = vmatpush3.msra.mxu1 %v541_v38 }
 0x149   :  { %962 = vmatprep.subr.mxu1 %v556_v41 }
 0x14a   :  { %v1414_v58 = vpop.f32.mrf.mxu0  ;;  %963 = vmatpush3.msra.mxu1 %v540_v42 }
 0x14b   :  { %964 = vmatprep.subr.mxu1 %v555_v56 }
 0x14c   :  { %v1419_v62 = vpop.f32.mrf.mxu0  ;;  %965 = vmatpush3.msra.mxu1 %v539_v57 }
 0x14d   :  { %966 = vmatprep.subr.mxu1 %v554_v60 }
 0x14e   :  { %v1425_v1 = vpop.f32.mrf.mxu0  ;;  %967 = vmatpush3.msra.mxu1 %v538_v61 }
 0x14f   :  { %968 = vmatprep.subr.mxu1 %v553_v63  ;;  %v417_v48 = vadd.f32 %v1425_v1, %v1379_v59 }
 0x150   :  { %v1431_v4 = vpop.f32.mrf.mxu0  ;;  %969 = vmatpush3.msra.mxu1 %v537_v0 }
 0x151   :  { %970 = vmatprep.subr.mxu1 %v552_v32 }
 0x152   :  { %v1437_v8 = vpop.f32.mrf.mxu0  ;;  %971 = vmatpush3.msra.mxu1 %v536_v3 }
 0x153   :  { %972 = vmatprep.subr.mxu1 %v551_v29 }
 0x154   :  { %v1443_v12 = vpop.f32.mrf.mxu0  ;;  %973 = vmatpush3.msra.mxu1 %v535_v7 }
 0x155   :  { %974 = vmatprep.subr.mxu1 %v550_v30  ;;  %v427_v30 = vadd.f32 %v1437_v8, %v1379_v59 }
 0x156   :  { %v1139_v15 = vpop.f32.mrf.mxu0  ;;  %975 = vmatpush3.msra.mxu1 %v534_v10 }
 0x157   :  { %976 = vmatprep.subr.mxu1 %v549_v27  ;;  %v437_v32 = vadd.f32 %v1139_v15, %v1379_v59  ;;  %v422_v27 = vadd.f32 %v1379_v59, %v1443_v12 }
 0x158   :  { %v431_v19 = vpop.f32.mrf.mxu0  ;;  %977 = vmatpush3.msra.mxu1 %v533_v14 }
 0x159   :  { %978 = vmatprep.subr.mxu1 %v548_v17  ;;  %v432_v29 = vadd.f32 %v1379_v59, %v431_v19  ;;  %v575_v9 = vmax.f32 %v437_v32, 0.0  ;;  %v573_v17 = vmax.f32 %v427_v30, 0.0  ;;  %v572_v19 = vmax.f32 %v422_v27, 0.0  ;;  %v72_v32 = vld [vmem:[#allocation5 + $0xe8] sm:$0xff]  ;;  %v62_v30 = vld [vmem:[#allocation5 + $0x98] sm:$0xff] }
 0x15a   :  { %v1142_v22 = vpop.f32.mrf.mxu0  ;;  %979 = vmatpush3.msra.mxu1 %v532_v18  ;;  %v412_v18 = vadd.f32 %v1379_v59, %v1431_v4 }
 0x15b   :  { %980 = vmatprep.subr.mxu1 %v547_v44  ;;  %v447_v34 = vadd.f32 %v1142_v22, %v1379_v59  ;;  %v574_v13 = vmax.f32 %v432_v29, 0.0  ;;  %v571_v22 = vmax.f32 %v417_v48, 0.0  ;;  %v66_v29 = vld [vmem:[#allocation5 + $0xb8] sm:$0xff] }
 0x15c   :  { %v441_v35 = vpop.f32.mrf.mxu0  ;;  %981 = vmatpush3.msra.mxu1 %v531_v20  ;;  %v407_v20 = vadd.f32 %v1414_v58, %v1379_v59 }
 0x15d   :  { %982 = vmatprep.subr.mxu1 %v546_v25  ;;  %v442_v51 = vadd.f32 %v1379_v59, %v441_v35  ;;  %v577_v2 = vmax.f32 %v447_v34, 0.0  ;;  %v570_v35 = vmax.f32 %v412_v18, 0.0 }
 0x15e   :  { %v1453_v46 = vpop.f32.mrf.mxu0  ;;  %983 = vmatpush3.msra.mxu1 %v530_v37  ;;  %v402_v37 = vadd.f32 %v1379_v59, %v1419_v62 }
 0x15f   :  { %868 = vmatmul.mubr.msk.f32.vlgmr.msra.gmra.mxu1 %vm1335_vm5, %v1303_v23  ;;  %v576_v5 = vmax.f32 %v442_v51, 0.0 }
 0x160   :  { %v1458_v26 = vpop.f32.mrf.mxu0  ;;  %869 = vmatprep.mubr.msk.f32.mxu1 %vm1359_vm8, %v1303_v23  ;;  %v568_v62 = vmax.f32 %v402_v37, 0.0 }
 0x162   :  { %v1463_v38 = vpop.f32.mrf.mxu0 }
 0x164   :  { %v1465_v40 = vpop.f32.mrf.mxu0 }
 0x166   :  { %v1151_v41 = vpop.f32.mrf.mxu0 }
 0x167   :  { %v477_v4 = vadd.f32 %v1151_v41, %v1379_v59  ;;  %v467_v41 = vadd.f32 %v1463_v38, %v1379_v59  ;;  %v457_v38 = vadd.f32 %v1453_v46, %v1379_v59 }
 0x168   :  { %v1467_v36 = vpop.f32.mrf.mxu0 }
 0x169   :  { %v472_v58 = vadd.f32 %v1379_v59, %v1467_v36  ;;  %v462_v36 = vadd.f32 %v1379_v59, %v1465_v40  ;;  %v452_v40 = vadd.f32 %v1379_v59, %v1458_v26  ;;  %v1304_v26 = vmov 0.0  }
 0x16a   :  { %v1154_v42 = vpop.f32.mrf.mxu0 }
 0x16b   :  { %v487_v12 = vadd.f32 %v1154_v42, %v1379_v59  ;;  %v397_v42 = vadd.f32 %v1404_v39, %v1379_v59  ;;  %v387_v39 = vadd.f32 %v1395_v16, %v1379_v59  ;;  %v377_v16 = vadd.f32 %v1387_v6, %v1379_v59  ;;  %v75_v6 = vld [vmem:[#allocation5 + $0x100] sm:$0xff] }
 0x16c   :  { %v481_v53 = vpop.f32.mrf.mxu0  ;;  %v580_v51 = vmax.f32 %v462_v36, 0.0 }
 0x16d   :  { %v482_v1 = vadd.f32 %v1379_v59, %v481_v53  ;;  %v563_v46 = vmax.f32 %v377_v16, 0.0 }
 0x16e   :  { %v1157_v56 = vpop.f32.mrf.mxu0 }
 0x16f   :  { %v497_v14 = vadd.f32 %v1157_v56, %v1379_v59  ;;  %v585_v56 = vmax.f32 %v487_v12, 0.0  ;;  %v584_v53 = vmax.f32 %v482_v1, 0.0 }
 0x170   :  { %v491_v33 = vpop.f32.mrf.mxu0 }
 0x171   :  { %v492_v8 = vadd.f32 %v1379_v59, %v491_v33  ;;  %v587_v44 = vmax.f32 %v497_v14, 0.0  ;;  %v569_v33 = vmax.f32 %v407_v20, 0.0 }
 0x172   :  { %v1160_v57 = vpop.f32.mrf.mxu0 }
 0x173   :  { %v507_v7 = vadd.f32 %v1160_v57, %v1379_v59  ;;  %v586_v25 = vmax.f32 %v492_v8, 0.0  ;;  %v392_v57 = vadd.f32 %v1379_v59, %v1409_v55  ;;  %v382_v55 = vadd.f32 %v1379_v59, %v1399_v21 }
 0x174   :  { %v501_v24 = vpop.f32.mrf.mxu0  ;;  %v372_v21 = vadd.f32 %v1379_v59, %v1391_v11  ;;  %v73_v11 = vld [vmem:[#allocation5 + $0xf0] sm:$0xff] }
 0x175   :  { %v502_v10 = vadd.f32 %v1379_v59, %v501_v24  ;;  %v589_v15 = vmax.f32 %v507_v7, 0.0  ;;  %v583_v24 = vmax.f32 %v477_v4, 0.0  ;;  %v566_v34 = vmax.f32 %v392_v57, 0.0  ;;  %v64_v7 = vld [vmem:[#allocation5 + $0xa8] sm:$0xff] }
 0x176   :  { %v1163_v54 = vpop.f32.mrf.mxu0 }
 0x177   :  { %v517_v31 = vadd.f32 %v1163_v54, %v1379_v59  ;;  %v588_v28 = vmax.f32 %v502_v10, 0.0  ;;  %v567_v54 = vmax.f32 %v397_v42, 0.0  ;;  %v60_v10 = vld [vmem:[#allocation5 + $0x88] sm:$0xff] }
 0x178   :  { %v511_v60 = vpop.f32.mrf.mxu0 }
 0x179   :  { %v512_v3 = vadd.f32 %v1379_v59, %v511_v60  ;;  %v591_v50 = vmax.f32 %v517_v31, 0.0  ;;  %v582_v60 = vmax.f32 %v472_v58, 0.0  ;;  %v579_v31 = vmax.f32 %v457_v38, 0.0 }
 0x17a   :  { %v1166_v61 = vpop.f32.mrf.mxu0 }
 0x17b   :  { %v527_v43 = vadd.f32 %v1166_v61, %v1379_v59  ;;  %v590_v47 = vmax.f32 %v512_v3, 0.0  ;;  %v581_v61 = vmax.f32 %v467_v41, 0.0  ;;  %v70_v3 = vld [vmem:[#allocation5 + $0xd8] sm:$0xff] }
 0x17c   :  { %v521_v63 = vpop.f32.mrf.mxu0 }
 0x17d   :  { %v593_v0 = vmax.f32 %v527_v43, 0.0  ;;  %v522_v52 = vadd.f32 %v1379_v59, %v521_v63  ;;  %v565_v43 = vmax.f32 %v387_v39, 0.0  ;;  %v564_v63 = vmax.f32 %v382_v55, 0.0  ;;  %v74_v59 = vld [vmem:[#allocation5 + $0xf8] sm:$0xff] }
 0x17f   :  { %v592_v49 = vmax.f32 %v522_v52, 0.0  ;;  %987 = vmatprep.subr.mxu1 %v593_v0  ;;  %v578_v0 = vmax.f32 %v452_v40, 0.0  ;;  %v562_v52 = vmax.f32 %v372_v21, 0.0 }
 0x180   :  { %988 = vmatpush3.msra.mxu1 %v577_v2  ;;  %v71_v2 = vld [vmem:[#allocation5 + $0xe0] sm:$0xff] }
 0x181   :  { %989 = vmatprep.subr.mxu1 %v592_v49  ;;  %v67_v49 = vld [vmem:[#allocation5 + $0xc0] sm:$0xff] }
 0x182   :  { %990 = vmatpush3.msra.mxu1 %v576_v5  ;;  %v65_v5 = vld [vmem:[#allocation5 + $0xb0] sm:$0xff] }
 0x183   :  { %991 = vmatprep.subr.mxu1 %v591_v50  ;;  %v63_v50 = vld [vmem:[#allocation5 + $0xa0] sm:$0xff] }
 0x184   :  { %992 = vmatpush3.msra.mxu1 %v575_v9  ;;  %v61_v9 = vld [vmem:[#allocation5 + $0x90] sm:$0xff] }
 0x185   :  { %993 = vmatprep.subr.mxu1 %v590_v47 }
 0x186   :  { %994 = vmatpush3.msra.mxu1 %v574_v13 }
 0x187   :  { %995 = vmatprep.subr.mxu1 %v589_v15 }
 0x188   :  { %996 = vmatpush3.msra.mxu1 %v573_v17 }
 0x189   :  { %997 = vmatprep.subr.mxu1 %v588_v28 }
 0x18a   :  { %998 = vmatpush3.msra.mxu1 %v572_v19 }
 0x18b   :  { %999 = vmatprep.subr.mxu1 %v587_v44 }
 0x18c   :  { %1000 = vmatpush3.msra.mxu1 %v571_v22 }
 0x18d   :  { %1001 = vmatprep.subr.mxu1 %v586_v25 }
 0x18e   :  { %1002 = vmatpush3.msra.mxu1 %v570_v35 }
 0x18f   :  { %1003 = vmatprep.subr.mxu1 %v585_v56 }
 0x190   :  { %1004 = vmatpush3.msra.mxu1 %v569_v33 }
 0x191   :  { %1005 = vmatprep.subr.mxu1 %v584_v53 }
 0x192   :  { %1006 = vmatpush3.msra.mxu1 %v568_v62 }
 0x193   :  { %1007 = vmatprep.subr.mxu1 %v583_v24 }
 0x194   :  { %1008 = vmatpush3.msra.mxu1 %v567_v54 }
 0x195   :  { %1009 = vmatprep.subr.mxu1 %v582_v60 }
 0x196   :  { %1010 = vmatpush3.msra.mxu1 %v566_v34 }
 0x197   :  { %1011 = vmatprep.subr.mxu1 %v581_v61 }
 0x198   :  { %1012 = vmatpush3.msra.mxu1 %v565_v43 }
 0x199   :  { %1013 = vmatprep.subr.mxu1 %v580_v51 }
 0x19a   :  { %1014 = vmatpush3.msra.mxu1 %v564_v63 }
 0x19b   :  { %1015 = vmatprep.subr.mxu1 %v579_v31 }
 0x19c   :  { %1016 = vmatpush3.msra.mxu1 %v563_v46 }
 0x19d   :  { %1017 = vmatprep.subr.mxu1 %v578_v0 }
 0x19e   :  { %1018 = vmatpush3.msra.mxu1 %v562_v52 }
 0x19f   :  { %870 = vmatmul.mubr.msk.f32.vlgmr.msra.gmra.mxu1 %vm1365_vm11, %v1303_v23  ;;  %1167 = vmatprep.subr.mxu1 %v1304_v26  ;;  %v68_v23 = vld [vmem:[#allocation5 + $0xc8] sm:$0xff] }
 0x1a0   :  { %1168 = vmatpush3.msra.mxu1 %v75_v6  ;;  %1199 = vmatprep.mubr.msk.f32.mxu1 %vm1305_vm12, %v1304_v26 }
 0x1a1   :  { %1169 = vmatprep.subr.mxu1 %v1304_v26 }
 0x1a2   :  { %1170 = vmatpush3.msra.mxu1 %v74_v59 }
 0x1a3   :  { %1171 = vmatprep.subr.mxu1 %v1304_v26 }
 0x1a4   :  { %1172 = vmatpush3.msra.mxu1 %v73_v11 }
 0x1a5   :  { %1173 = vmatprep.subr.mxu1 %v1304_v26 }
 0x1a6   :  { %1174 = vmatpush3.msra.mxu1 %v72_v32 }
 0x1a7   :  { %1175 = vmatprep.subr.mxu1 %v1304_v26 }
 0x1a8   :  { %1176 = vmatpush3.msra.mxu1 %v71_v2 }
 0x1a9   :  { %1177 = vmatprep.subr.mxu1 %v1304_v26 }
 0x1aa   :  { %1178 = vmatpush3.msra.mxu1 %v70_v3 }
 0x1ab   :  { %1179 = vmatprep.subr.mxu1 %v1304_v26 }
 0x1ac   :  { %1180 = vmatpush3.msra.mxu1 %v69_v45 }
 0x1ad   :  { %1181 = vmatprep.subr.mxu1 %v1304_v26 }
 0x1ae   :  { %1182 = vmatpush3.msra.mxu1 %v68_v23 }
 0x1af   :  { %1183 = vmatprep.subr.mxu1 %v1304_v26 }
 0x1b0   :  { %1184 = vmatpush3.msra.mxu1 %v67_v49 }
 0x1b1   :  { %1185 = vmatprep.subr.mxu1 %v1304_v26 }
 0x1b2   :  { %1186 = vmatpush3.msra.mxu1 %v66_v29 }
 0x1b3   :  { %1187 = vmatprep.subr.mxu1 %v1304_v26 }
 0x1b4   :  { %1188 = vmatpush3.msra.mxu1 %v65_v5 }
 0x1b5   :  { %1189 = vmatprep.subr.mxu1 %v1304_v26 }
 0x1b6   :  { %1190 = vmatpush3.msra.mxu1 %v64_v7 }
 0x1b7   :  { %1191 = vmatprep.subr.mxu1 %v1304_v26 }
 0x1b8   :  { %1192 = vmatpush3.msra.mxu1 %v63_v50 }
 0x1b9   :  { %1193 = vmatprep.subr.mxu1 %v1304_v26 }
 0x1ba   :  { %1194 = vmatpush3.msra.mxu1 %v62_v30 }
 0x1bb   :  { %1195 = vmatprep.subr.mxu1 %v1304_v26 }
 0x1bc   :  { %1196 = vmatpush3.msra.mxu1 %v61_v9 }
 0x1bd   :  { %1197 = vmatprep.subr.mxu1 %v1304_v26 }
 0x1be   :  { %1198 = vmatpush3.msra.mxu1 %v60_v10 }
 0x21f   :  { %v984_v47 = vpop.f32.mrf.mxu1 }
 0x221   :  { %v985_v27 = vpop.f32.mrf.mxu1 }
 0x222   :  { %v986_v15 = vadd.f32 %v985_v27, %v984_v47 }
 0x25f   :  { %v1019_v13 = vpop.f32.mrf.mxu1 }
 0x261   :  { %v1020_v14 = vpop.f32.mrf.mxu1 }
 0x262   :  { %v1021_v48 = vadd.f32 %v1020_v14, %v1019_v13 }
 0x264   :  { %v757_v17 = vadd.f32 %v1021_v48, %v986_v15 }
 0x266   :  { %760 = vst [vmem:[#allocation7] sm:$0x3] %v757_v17  ;;  %1200 = vmatmul.mubr.f32.vlgmr.msra.gmra.mxu1 %v757_v17 }
 0x267   :  { %1262 = shalt.err (!%p1259_p0)
}
 0x268   :  { %845 = dma.vmem_to_hbm [thread:$0]  %s843_s1, 32, %s1529_s2, [#allocation4]   ;;  %v871_v8 = vld [vmem:[#allocation5 + $0x108] ss:$0 sm:$0xff] }
 0x269   :  { %s1307_s27 = smov [#allocation8]  }
 0x26a   :  { %s852_s28 = sshll.u32 %s1307_s27, 4  ;;  %s853_s28 = int_to_ptr.vmem [resolvable:$true] %s852_s28 }
 0x26b   :  { %s1271_s29 = scalar_lea.vmem %s853_s28, 32  ;;  %p1276_p2 = scmp.lt.s32.totalorder %s853_s28, %s853_s28 }
 0x26c   :  { %p1272_p1 = scmp.ne.s32.totalorder %s853_s28, %s1271_s29  ;;  %p1277_p3 = scmp.lt.s32.totalorder %s1271_s29, %s1271_s29 }
 0x26e   :  { %p1278_p4 = por %p1277_p3, %p1276_p2 }
 0x270   :  { %p1279_p5 = pnand %p1278_p4, %p1272_p1 }
 0x326   :  { %v831_v28 = vpop.f32.mrf.mxu1 }
 0x327   :  { %v832_v18 = vadd.f32 %v871_v8, %v831_v28 }
 0x328   :  { %v1201_v19 = vpop.f32.mrf.mxu1 }
 0x329   :  { %835 = vst [vmem:[#allocation8] sm:$0x3] %v832_v18 }
 0x32a   :  { %1282 = shalt.err (!%p1279_p5)
}
 0x32b   :  { %855 = dma.vmem_to_hbm [thread:$0]  %s853_s28, 32, %s1530_s3, [#allocation9]  }
 0x32c   :  { %1295 = dma.done.wait [#allocation4], 32  }
 0x32d   :  { %1296 = vsyncadd [#allocation4], 4294967264 }
 0x32e   :  { %1297 = dma.done.wait [#allocation9], 32  }
 0x32f   :  { %1298 = vsyncadd [#allocation9], 4294967264 }
 0x330   :  { %862 = vsyncpa [#allocation3], 1 }
 0x331   :  { %863 = vsyncpa [#allocation6], 1 }
 0x332   :  { %864 = vsyncpa [#allocation4], 1 }
 0x333   :  { %865 = vsyncpa [#allocation9], 1 }

</bundles_post_ra>
